<compile_context>
chip_gen: v7x
topology: tpu7x:2x2x1
jax: 0.10.0
libtpu: 0.0.40
codegen_flags: <defaults>
</compile_context>

<pallas_src>
import functools

import jax
import jax.numpy as jnp
from jax.experimental import pallas as pl
from jax.experimental.pallas import tpu as pltpu


def _round_up(x, m):
    return ((x + m - 1) // m) * m


# ----------------------------------------------------------------------------
# Kernel A: per-relation source projection  XW = X_src @ W_rel  (tiled over src rows),
# computed in f32, stored bf16 (halves HBM traffic of the stacked XW operand).
# ----------------------------------------------------------------------------
def _xw_kernel(x_ref, w_ref, o_ref):
    o_ref[...] = jnp.dot(
        x_ref[...], w_ref[...], preferred_element_type=jnp.float32
    ).astype(o_ref.dtype)


def project_src(x_src_pad, w_pad, tk):
    n_src_pad, fin = x_src_pad.shape
    fout_pad = w_pad.shape[1]
    return pl.pallas_call(
        _xw_kernel,
        out_shape=jax.ShapeDtypeStruct((n_src_pad, fout_pad), jnp.bfloat16),
        grid_spec=pltpu.PrefetchScalarGridSpec(
            num_scalar_prefetch=0,
            grid=(n_src_pad // tk,),
            in_specs=[
                pl.BlockSpec((tk, fin), lambda s: (s, 0)),
                pl.BlockSpec((fin, fout_pad), lambda s: (0, 0)),
            ],
            out_specs=pl.BlockSpec((tk, fout_pad), lambda s: (s, 0)),
        ),
        compiler_params=pltpu.CompilerParams(
            dimension_semantics=("parallel",),
            vmem_limit_bytes=64 * 1024 * 1024,
        ),
    )(x_src_pad, w_pad)


# ----------------------------------------------------------------------------
# Kernel B: fused cross-relation message passing + self-loop epilogue for one dst ntype.
#   grid = (dst_tiles, n_rel, src_tiles);  acc is a VMEM f32 scratch resident per dst tile.
# ----------------------------------------------------------------------------
def _fused_kernel(a_ref, xw_ref, xd_ref, wl_ref, b_ref, o_ref, acc_ref, *, use_relu):
    r = pl.program_id(1)
    s = pl.program_id(2)
    nr = pl.num_programs(1)
    ns = pl.num_programs(2)

    @pl.when((r == 0) & (s == 0))
    def _():
        acc_ref[...] = jnp.zeros_like(acc_ref)

    # bf16 x bf16 -> f32 accumulate on the MXU.
    acc_ref[...] += jnp.dot(
        a_ref[0], xw_ref[0], preferred_element_type=jnp.float32
    )

    @pl.when((r == nr - 1) & (s == ns - 1))
    def _():
        y = acc_ref[...] + jnp.dot(
            xd_ref[...], wl_ref[...], preferred_element_type=jnp.float32
        ) + b_ref[...]
        if use_relu:
            y = jnp.maximum(y, 0.0)
        o_ref[...] = y.astype(o_ref.dtype)


def fused_rel_apply(a_stack, xw_stack, x_dst_pad, w_loop_pad, b_pad, tm, tk, use_relu):
    n_rel, n_dst_pad, n_src_pad = a_stack.shape
    fout_pad = xw_stack.shape[2]
    fin = x_dst_pad.shape[1]
    grid = (n_dst_pad // tm, n_rel, n_src_pad // tk)
    return pl.pallas_call(
        functools.partial(_fused_kernel, use_relu=use_relu),
        out_shape=jax.ShapeDtypeStruct((n_dst_pad, fout_pad), jnp.float32),
        grid_spec=pltpu.PrefetchScalarGridSpec(
            num_scalar_prefetch=0,
            grid=grid,
            in_specs=[
                pl.BlockSpec((1, tm, tk), lambda i, r, s: (r, i, s)),        # A[rel]
                pl.BlockSpec((1, tk, fout_pad), lambda i, r, s: (r, s, 0)),  # XW[rel]
                pl.BlockSpec((tm, fin), lambda i, r, s: (i, 0)),             # X_dst tile
                pl.BlockSpec((fin, fout_pad), lambda i, r, s: (0, 0)),       # W_loop
                pl.BlockSpec((1, fout_pad), lambda i, r, s: (0, 0)),         # b_loop
            ],
            out_specs=pl.BlockSpec((tm, fout_pad), lambda i, r, s: (i, 0)),
            scratch_shapes=[pltpu.VMEM((tm, fout_pad), jnp.float32)],
        ),
        compiler_params=pltpu.CompilerParams(
            # dst tiles shard across TensorCores (v7x megacore); rel/src are reductions.
            dimension_semantics=("parallel", "arbitrary", "arbitrary"),
            vmem_limit_bytes=64 * 1024 * 1024,  # sized for v7x's smaller VMEM too
        ),
    )(a_stack, xw_stack, x_dst_pad, w_loop_pad, b_pad)


# ----------------------------------------------------------------------------
# JAX-side module mirroring RelGraphConvLayer.__init__ / forward
# ----------------------------------------------------------------------------
def _linear_init(key, in_f, out_f, with_bias):
    bound = 1.0 / (in_f ** 0.5)
    kw, kb = jax.random.split(key)
    w = jax.random.uniform(kw, (in_f, out_f), jnp.float32, -bound, bound)
    b = (jax.random.uniform(kb, (1, out_f), jnp.float32, -bound, bound)
         if with_bias else None)
    return w, b


class RelGraphConvLayer:
    def __init__(self, in_feat, out_feat, ntypes, rel_names, key,
                 activation="relu", dropout=0.0, tm=256, tk=1024):
        self.in_feat = in_feat
        self.out_feat = out_feat
        self.ntypes = list(ntypes)
        self.rel_names = list(rel_names)
        self.activation = activation
        self.dropout = dropout  # TODO(synk): training-mode dropout not implemented (p=0.0 -> identity).
        self.tm = tm            # dst-row tile (multiple of 16)
        self.tk = tk            # src-col tile (multiple of 128)

        keys = jax.random.split(key, len(self.rel_names) + len(self.ntypes))
        self.weight = {}       # per-relation projection, no bias (== torch Linear.weight.T)
        for i, rel in enumerate(self.rel_names):
            w, _ = _linear_init(keys[i], in_feat, out_feat, with_bias=False)
            self.weight[rel] = w
        self.loop_w, self.loop_b = {}, {}   # per-ntype self-loop Linear with bias
        for j, nt in enumerate(self.ntypes):
            w, b = _linear_init(keys[len(self.rel_names) + j], in_feat, out_feat,
                                with_bias=True)
            self.loop_w[nt], self.loop_b[nt] = w, b

    def __call__(self, graph, inputs):
        """graph: dict rel_name -> (src_ntype, dst_ntype, A_norm [n_dst, n_src])
           inputs: dict ntype -> [n_nodes, in_feat] float32
           NOTE: assumes dst nodes are a prefix of each ntype's node ordering (DGL block convention)."""
        fout_pad = _round_up(self.out_feat, 128)   # lane-dense output (>=128 lanes)
        use_relu = (self.activation == "relu")

        # group relations by destination node type (HeteroGraphConv aggregate='sum')
        by_dst = {}
        for rel in self.rel_names:
            if rel not in graph:
                continue
            src, dst, a = graph[rel]
            by_dst.setdefault(dst, []).append((rel, src, a))

        out = {}
        for dst, rels in by_dst.items():
            n_dst = rels[0][2].shape[0]
            n_dst_pad = _round_up(n_dst, 16)
            tm = min(self.tm, n_dst_pad)
            n_dst_pad = _round_up(n_dst_pad, tm)

            n_src_max = max(a.shape[1] for _, _, a in rels)
            n_src_pad = _round_up(n_src_max, 128)
            tk = min(self.tk, n_src_pad)
            n_src_pad = _round_up(n_src_pad, tk)

            a_blocks, xw_blocks = [], []
            for rel, src, a in rels:
                x_src = inputs[src]
                x_src_pad = jnp.pad(
                    x_src, ((0, n_src_pad - x_src.shape[0]), (0, 0)))
                w_pad = jnp.pad(
                    self.weight[rel], ((0, 0), (0, fout_pad - self.out_feat)))
                # hoisted per-relation projection, stored bf16 lane-dense
                xw_blocks.append(project_src(x_src_pad, w_pad, tk))
                a_pad = jnp.pad(
                    a, ((0, n_dst_pad - a.shape[0]), (0, n_src_pad - a.shape[1])))
                a_blocks.append(a_pad.astype(jnp.bfloat16))

            a_stack = jnp.stack(a_blocks, axis=0)       # [R, n_dst_pad, n_src_pad] bf16
            xw_stack = jnp.stack(xw_blocks, axis=0)     # [R, n_src_pad, fout_pad] bf16

            x_dst = inputs[dst][:n_dst]                 # inputs_dst[ntype]
            x_dst_pad = jnp.pad(x_dst, ((0, n_dst_pad - n_dst), (0, 0)))
            wl_pad = jnp.pad(self.loop_w[dst],
                             ((0, 0), (0, fout_pad - self.out_feat)))
            b_pad = jnp.pad(self.loop_b[dst],
                            ((0, 0), (0, fout_pad - self.out_feat)))

            y = fused_rel_apply(a_stack, xw_stack, x_dst_pad, wl_pad, b_pad,
                                tm, tk, use_relu)
            out[dst] = y[:n_dst, :self.out_feat]
        return out


# ----------------------------------------------------------------------------
# Example / self-check
# ----------------------------------------------------------------------------
def _make_norm_adj(key, nd, ns, p=0.3):
    adj = jax.random.bernoulli(key, p, (nd, ns)).astype(jnp.float32)
    rows = jnp.arange(nd)
    adj = adj.at[rows, rows % ns].set(1.0)   # every dst node has >= 1 in-edge
    deg = adj.sum(axis=1, keepdims=True)
    return adj / deg                          # norm='right'


def _reference(layer, graph, inputs):
    hs = {}
    for rel in layer.rel_names:
        src, dst, a = graph[rel]
        hs[dst] = hs.get(dst, 0.0) + a @ (inputs[src] @ layer.weight[rel])
    out = {}
    for nt, h in hs.items():
        y = h + inputs[nt][: h.shape[0]] @ layer.loop_w[nt] + layer.loop_b[nt]
        out[nt] = jnp.maximum(y, 0.0) if layer.activation == "relu" else y
    return out


if __name__ == "__main__":
    key = jax.random.PRNGKey(0)
    k_param, k_feat, k_graph = jax.random.split(key, 3)

    in_feat, out_feat = 32, 32
    n_nodes = {"paper": 16, "author": 16, "institution": 8}
    ntypes = list(n_nodes.keys())
    rel_types = {
        "writes": ("author", "paper"),
        "cites": ("paper", "paper"),
        "affiliated_with": ("author", "institution"),
    }
    rel_names = list(rel_types.keys())

    fkeys = jax.random.split(k_feat, len(ntypes))
    inputs = {nt: jax.random.normal(fk, (n_nodes[nt], in_feat), jnp.float32)
              for nt, fk in zip(ntypes, fkeys)}

    gkeys = jax.random.split(k_graph, len(rel_names))
    graph = {}
    for rel, gk in zip(rel_names, gkeys):
        src, dst = rel_types[rel]
        graph[rel] = (src, dst, _make_norm_adj(gk, n_nodes[dst], n_nodes[src]))

    layer = RelGraphConvLayer(in_feat, out_feat, ntypes, rel_names, k_param,
                              activation="relu", dropout=0.0)

    out = layer(graph, inputs)
    out = {k: jax.block_until_ready(v) for k, v in out.items()}

    ref = _reference(layer, graph, inputs)
    for nt in out:
        assert out[nt].shape == (n_nodes[nt], out_feat)
        # bf16 MXU inputs -> slightly looser tolerance vs the pure-f32 reference
        assert jnp.allclose(out[nt], ref[nt], rtol=5e-2, atol=5e-2), nt

    print("KERNEL_OK")
</pallas_src>

<mosaic_0001>
module attributes {stable_mosaic.version = 11 : i64} {
  func.func @_xw_kernel(%arg0: i32, %arg1: memref<128x32xf32, #tpu.memory_space<vmem>>, %arg2: memref<32x128xf32, #tpu.memory_space<vmem>>, %arg3: memref<128x128xbf16, #tpu.memory_space<vmem>>) attributes {dimension_semantics = [#tpu.dimension_semantics<parallel>], iteration_bounds = array<i64: 1>, scalar_prefetch = 0 : i64, scratch_operands = 0 : i64, tpu.core_type = #tpu.core_type<tc>, window_params = [{transform_indices = @transform_0, window_bounds = array<i64: 128, 32>}, {pipeline_mode = #tpu.pipeline_mode<synchronous>, transform_indices = @transform_1, window_bounds = array<i64: 32, 128>}, {transform_indices = @transform_2, window_bounds = array<i64: 128, 128>}]} {
    %c0 = arith.constant 0 : index
    %c0_0 = arith.constant 0 : index
    %0 = vector.load %arg1[%c0, %c0_0] : memref<128x32xf32, #tpu.memory_space<vmem>>, vector<128x32xf32>
    %c0_1 = arith.constant 0 : index
    %c0_2 = arith.constant 0 : index
    %1 = vector.load %arg2[%c0_1, %c0_2] : memref<32x128xf32, #tpu.memory_space<vmem>>, vector<32x128xf32>
    %cst = arith.constant dense<0.000000e+00> : vector<128x128xf32>
    %2 = tpu.matmul %0, %1, %cst {dimension_numbers = #tpu.dot_dimension_numbers<[1], [0], [0], [1], [0, 0, 1, 1], [], []>} : vector<128x32xf32>, vector<32x128xf32>, vector<128x128xf32> -> vector<128x128xf32>
    %3 = arith.truncf %2 : vector<128x128xf32> to vector<128x128xbf16>
    %c0_3 = arith.constant 0 : index
    %c0_4 = arith.constant 0 : index
    %4 = vector.load %arg3[%c0_3, %c0_4] : memref<128x128xbf16, #tpu.memory_space<vmem>>, vector<128x128xbf16>
    tpu.vector_store %arg3[%c0_3, %c0_4], %3 {strides = array<i32>} : memref<128x128xbf16, #tpu.memory_space<vmem>>, vector<128x128xbf16>,
    return
  }
  func.func @transform_0(%arg0: i32) -> (i32, i32) {
    %c0_i32 = arith.constant 0 : i32
    %c0_i32_0 = arith.constant 0 : i32
    return %arg0, %c0_i32 : i32, i32
  }
  func.func @transform_1(%arg0: i32) -> (i32, i32) {
    %c0_i32 = arith.constant 0 : i32
    %c0_i32_0 = arith.constant 0 : i32
    %c0_i32_1 = arith.constant 0 : i32
    return %c0_i32, %c0_i32_0 : i32, i32
  }
  func.func @transform_2(%arg0: i32) -> (i32, i32) {
    %c0_i32 = arith.constant 0 : i32
    %c0_i32_0 = arith.constant 0 : i32
    return %arg0, %c0_i32 : i32, i32
  }
}

</mosaic_0001>

<bundles_post_ra>
// kernel: tpu_custom_call.1
= control target key start
LH: loop header
LB: loop body
LE: loop exit
PB: predicated region body
PF: predicated region fallthrough
CT: control target
= control target key end

     0   :  { %7 = vsyncpa [#allocation3], 0  ;;  %s664_s0 = inlined_call_operand.hbm [shape: f32[128,32], index: 0, kind: input, shape index: {}]   ;;  %s665_s1 = inlined_call_operand.hbm [shape: f32[32,128], index: 1, kind: input, shape index: {}]   ;;  %s666_s2 = inlined_call_operand.hbm [shape: bf16[128,128], index: 2, kind: output, shape index: {}]  }
   0x1   :  { %8 = vsyncpa [#allocation6], 0 }
   0x2   :  { %9 = vsyncpa [#allocation4], 0  ;;  %s590_s9 = smov [#allocation2]   ;;  %s518_s13 = scalar_lea.hbm %s664_s0, 2048 }
   0x3   :  { %s15_s10 = sshll.u32 %s590_s9, 4  ;;  %p519_p0 = scmp.ne.s32.totalorder %s664_s0, %s518_s13  ;;  %s16_s10 = int_to_ptr.vmem [resolvable:$true] %s15_s10 }
   0x4   :  { %p522_p1 = scmp.lt.u32.totalorder %s518_s13, %s664_s0 }
   0x6   :  { %p524_p2 = pnand %p522_p1, %p519_p0 }
   0x8   :  { %527 = shalt.err (!%p524_p2)
}
   0x9   :  { %s528_s18 = scalar_lea.vmem %s16_s10, 2048  ;;  %p533_p4 = scmp.lt.s32.totalorder %s16_s10, %s16_s10 }
   0xa   :  { %p529_p3 = scmp.ne.s32.totalorder %s16_s10, %s528_s18  ;;  %p534_p5 = scmp.lt.s32.totalorder %s528_s18, %s528_s18 }
   0xc   :  { %p535_p6 = por %p534_p5, %p533_p4 }
   0xe   :  { %p536_p7 = pnand %p535_p6, %p529_p3 }
  0x10   :  { %539 = shalt.err (!%p536_p7)
}
  0x11   :  { %s591_s19 = smov 128   ;;  %s592_s20 = smov 8  }
  0x12   :  { %21 = dma.hbm_to_vmem [thread:$0]  %s664_s0, 2048, %s16_s10, [#allocation3], %s591_s19, %s591_s19, %s592_s20  }
  0x13   :  { %s593_s23 = smov [#allocation5]   ;;  %s540_s27 = scalar_lea.hbm %s665_s1, 512 }
  0x14   :  { %s27_s24 = sshll.u32 %s593_s23, 4  ;;  %p541_p8 = scmp.ne.s32.totalorder %s665_s1, %s540_s27  ;;  %s28_s24 = int_to_ptr.vmem [resolvable:$true] %s27_s24 }
  0x15   :  { %p544_p9 = scmp.lt.u32.totalorder %s540_s27, %s665_s1 }
  0x17   :  { %p546_p10 = pnand %p544_p9, %p541_p8 }
  0x19   :  { %549 = shalt.err (!%p546_p10)
}
  0x1a   :  { %s550_s4 = scalar_lea.vmem %s28_s24, 512  ;;  %p555_p12 = scmp.lt.s32.totalorder %s28_s24, %s28_s24 }
  0x1b   :  { %p551_p11 = scmp.ne.s32.totalorder %s28_s24, %s550_s4  ;;  %p556_p13 = scmp.lt.s32.totalorder %s550_s4, %s550_s4 }
  0x1d   :  { %p557_p0 = por %p556_p13, %p555_p12 }
  0x1f   :  { %p558_p1 = pnand %p557_p0, %p551_p11 }
  0x21   :  { %561 = shalt.err (!%p558_p1)
}
  0x22   :  { %33 = dma.hbm_to_vmem [thread:$0]  %s665_s1, 512, %s28_s24, [#allocation6], %s591_s19, %s591_s19, %s592_s20  }
  0x23   :  { %584 = dma.done.wait [#allocation3], 2048  }
  0x24   :  { %585 = vsyncadd [#allocation3], 4294965248 }
  0x25   :  { %586 = dma.done.wait [#allocation6], 512  }
  0x26   :  { %587 = vsyncadd [#allocation6], 4294966784  ;;  %vm60_vm0 = vcmask 261120   ;;  %v56_v0 = vld [vmem:[#allocation5] sm:$0xff]  ;;  %v57_v1 = vld [vmem:[#allocation5 + $0x8] sm:$0xff]  ;;  %s594_s1 = smov [#allocation7]  }
  0x27   :  { %v58_v2 = vld [vmem:[#allocation5 + $0x10] sm:$0xff]  ;;  %v499_v3 = vpack.c.bf16 %v57_v1, %v56_v0  ;;  %v59_v4 = vld [vmem:[#allocation5 + $0x18] sm:$0xff]  ;;  %v40_v5 = vld [vmem:[#allocation2] sm:$0xff]  ;;  %s339_s6 = sshll.u32 %s594_s1, 4  ;;  %s340_s6 = int_to_ptr.vmem [resolvable:$true] %s339_s6 }
  0x28   :  { %v48_v6 = vld [vmem:[#allocation2 + $0x40] sm:$0xff]  ;;  %v503_v7 = vpack.c.bf16 %v59_v4, %v58_v2  ;;  %475 = vmatprep.mubr.msk.f32.mxu0 %vm60_vm0, %v40_v5  ;;  %v41_v8 = vld [vmem:[#allocation2 + $0x8] sm:$0xff]  ;;  %v42_v10 = vld [vmem:[#allocation2 + $0x10] sm:$0xff]  ;;  %s562_s7 = scalar_lea.vmem %s340_s6, 1024  ;;  %p567_p3 = scmp.lt.s32.totalorder %s340_s6, %s340_s6 }
  0x29   :  { %487 = vmatprep.mubr.msk.f32.mxu1 %vm60_vm0, %v48_v6  ;;  %500 = vmatprep.subr.bf16.mxu0 %v499_v3  ;;  %v49_v9 = vld [vmem:[#allocation2 + $0x48] sm:$0xff]  ;;  %v50_v11 = vld [vmem:[#allocation2 + $0x50] sm:$0xff]  ;;  %v43_v12 = vld [vmem:[#allocation2 + $0x18] sm:$0xff]  ;;  %p563_p2 = scmp.ne.s32.totalorder %s340_s6, %s562_s7  ;;  %p568_p4 = scmp.lt.s32.totalorder %s562_s7, %s562_s7 }
  0x2a   :  { %507 = vmatprep.subr.bf16.mxu1 %v499_v3  ;;  %502 = vmatpush3.bf16.msra.mxu0 %v499_v3  ;;  %v51_v13 = vld [vmem:[#allocation2 + $0x58] sm:$0xff]  ;;  %v44_v14 = vld [vmem:[#allocation2 + $0x20] sm:$0xff]  ;;  %v45_v16 = vld [vmem:[#allocation2 + $0x28] sm:$0xff] }
  0x2b   :  { %509 = vmatpush3.bf16.msra.mxu1 %v499_v3  ;;  %504 = vmatprep.subr.bf16.mxu0 %v503_v7  ;;  %v52_v15 = vld [vmem:[#allocation2 + $0x60] sm:$0xff]  ;;  %v53_v17 = vld [vmem:[#allocation2 + $0x68] sm:$0xff]  ;;  %v46_v18 = vld [vmem:[#allocation2 + $0x30] sm:$0xff]  ;;  %p569_p5 = por %p568_p4, %p567_p3 }
  0x2c   :  { %508 = vmatprep.subr.bf16.mxu1 %v503_v7  ;;  %v54_v19 = vld [vmem:[#allocation2 + $0x70] sm:$0xff]  ;;  %v47_v20 = vld [vmem:[#allocation2 + $0x38] sm:$0xff] }
  0x2d   :  { %v55_v21 = vld [vmem:[#allocation2 + $0x78] sm:$0xff]  ;;  %p570_p6 = pnand %p569_p5, %p563_p2 }
  0x2e   :  { %506 = vmatpush3.bf16.msra.mxu0 %v503_v7 }
  0x2f   :  { %510 = vmatpush3.bf16.msra.mxu1 %v503_v7 }
  0x31   :  { %476 = vmatmul.mubr.msk.f32.vlgmr.msra.gmra.mrb[0].mxu0 %vm60_vm0, %v41_v8 }
  0x32   :  { %488 = vmatmul.mubr.msk.f32.vlgmr.msra.gmra.mrb[0].mxu1 %vm60_vm0, %v49_v9  ;;  %478 = vmatprep.mubr.msk.f32.mxu0 %vm60_vm0, %v42_v10 }
  0x33   :  { %490 = vmatprep.mubr.msk.f32.mxu1 %vm60_vm0, %v50_v11 }
  0x35   :  { %479 = vmatmul.mubr.msk.f32.gmra.mrb[2].mxu0 %vm60_vm0, %v43_v12 }
  0x36   :  { %491 = vmatmul.mubr.msk.f32.gmra.mrb[2].mxu1 %vm60_vm0, %v51_v13  ;;  %481 = vmatprep.mubr.msk.f32.mxu0 %vm60_vm0, %v44_v14 }
  0x37   :  { %493 = vmatprep.mubr.msk.f32.mxu1 %vm60_vm0, %v52_v15 }
  0x39   :  { %482 = vmatmul.mubr.msk.f32.gmra.mrb[4].mxu0 %vm60_vm0, %v45_v16 }
  0x3a   :  { %494 = vmatmul.mubr.msk.f32.gmra.mrb[4].mxu1 %vm60_vm0, %v53_v17  ;;  %484 = vmatprep.mubr.msk.f32.mxu0 %vm60_vm0, %v46_v18 }
  0x3b   :  { %496 = vmatprep.mubr.msk.f32.mxu1 %vm60_vm0, %v54_v19 }
  0x3d   :  { %485 = vmatmul.mubr.msk.f32.gmra.mrb[6].mxu0 %vm60_vm0, %v47_v20 }
  0x3e   :  { %497 = vmatmul.mubr.msk.f32.gmra.mrb[6].mxu1 %vm60_vm0, %v55_v21 }
 0x104   :  { %v477_v22 = vpop.f32.mrb[0].mxu0 }
 0x105   :  { %v489_v23 = vpop.f32.mrb[0].mxu1  ;;  %v175_v24 = vpop.f32.mrb[1].mxu0 }
 0x106   :  { %v215_v25 = vpop.f32.mrb[1].mxu1  ;;  %v403_v26 = vpack.c.bf16 %v477_v22, %v175_v24 }
 0x107   :  { %v423_v27 = vpack.c.bf16 %v489_v23, %v215_v25 }
 0x108   :  { %404 = vst [vmem:[#allocation7] sm:$0xff] %v403_v26   ;;  %v480_v28 = vpop.f32.mrb[2].mxu0 }
 0x109   :  { %443 = vst [vmem:[#allocation7 + $0x20] sm:$0xff] %v423_v27   ;;  %v492_v29 = vpop.f32.mrb[2].mxu1  ;;  %v185_v30 = vpop.f32.mrb[3].mxu0 }
 0x10a   :  { %v225_v31 = vpop.f32.mrb[3].mxu1  ;;  %v408_v32 = vpack.c.bf16 %v480_v28, %v185_v30 }
 0x10b   :  { %v428_v33 = vpack.c.bf16 %v492_v29, %v225_v31 }
 0x10c   :  { %440 = vst [vmem:[#allocation7 + $0x8] sm:$0xff] %v408_v32   ;;  %v483_v34 = vpop.f32.mrb[4].mxu0 }
 0x10d   :  { %444 = vst [vmem:[#allocation7 + $0x28] sm:$0xff] %v428_v33   ;;  %v495_v35 = vpop.f32.mrb[4].mxu1  ;;  %v195_v36 = vpop.f32.mrb[5].mxu0 }
 0x10e   :  { %v235_v37 = vpop.f32.mrb[5].mxu1  ;;  %v413_v38 = vpack.c.bf16 %v483_v34, %v195_v36 }
 0x10f   :  { %v433_v39 = vpack.c.bf16 %v495_v35, %v235_v37 }
 0x110   :  { %441 = vst [vmem:[#allocation7 + $0x10] sm:$0xff] %v413_v38   ;;  %v486_v40 = vpop.f32.mrb[6].mxu0 }
 0x111   :  { %445 = vst [vmem:[#allocation7 + $0x30] sm:$0xff] %v433_v39   ;;  %v498_v41 = vpop.f32.mrb[6].mxu1  ;;  %v205_v42 = vpop.f32.mrb[7].mxu0 }
 0x112   :  { %v245_v43 = vpop.f32.mrb[7].mxu1  ;;  %v418_v44 = vpack.c.bf16 %v486_v40, %v205_v42 }
 0x113   :  { %v438_v45 = vpack.c.bf16 %v498_v41, %v245_v43 }
 0x114   :  { %442 = vst [vmem:[#allocation7 + $0x18] sm:$0xff] %v418_v44  }
 0x115   :  { %446 = vst [vmem:[#allocation7 + $0x38] sm:$0xff] %v438_v45  }
 0x116   :  { %573 = shalt.err (!%p570_p6)
}
 0x117   :  { %s574_s10 = scalar_lea.hbm %s666_s2, 1024 }
 0x118   :  { %p575_p7 = scmp.ne.s32.totalorder %s666_s2, %s574_s10  ;;  %p578_p8 = scmp.lt.u32.totalorder %s574_s10, %s666_s2 }
 0x11a   :  { %p580_p9 = pnand %p578_p8, %p575_p7 }
 0x11c   :  { %583 = shalt.err (!%p580_p9)
}
 0x11d   :  { %s595_s15 = smov 64   ;;  %s596_s16 = smov 4  }
 0x11e   :  { %345 = dma.vmem_to_hbm [thread:$0]  %s340_s6, 1024, %s666_s2, [#allocation4], %s595_s15, %s595_s15, %s596_s16  }
 0x11f   :  { %588 = dma.done.wait [#allocation4], 1024  }
 0x120   :  { %589 = vsyncadd [#allocation4], 4294966272 }
 0x121   :  { %349 = vsyncpa [#allocation3], 1 }
 0x122   :  { %350 = vsyncpa [#allocation6], 1 }
 0x123   :  { %351 = vsyncpa [#allocation4], 1 }

</bundles_post_ra>
